<compile_context>
chip_gen: v6e
topology: v6e:2x2x1
jax: 0.10.0
libtpu: 0.0.40
codegen_flags: <defaults>
</compile_context>

<pallas_src>
import functools

import jax
import jax.numpy as jnp
from jax.experimental import pallas as pl
from jax.experimental.pallas import tpu as pltpu

# AntBulletEnv-v0 sizes: obs dim 28, action dim 8.
STATE_DIM = 28
ACTION_DIM = 8
HIDDEN1 = 400
HIDDEN2 = 300
MAX_ACTION = 1.0  # env.action_space.high[0] for AntBulletEnv-v0


def _round_up(n, m):
    return ((n + m - 1) // m) * m


def _actor_kernel(x_ref, w1_ref, b1_ref, w2_ref, b2_ref, w3_ref, b3_ref,
                  o_ref, *, max_action):
    # Layer 1: (TB, S) @ (S, 512) -> f32 acc; bias + ReLU in f32.
    x = x_ref[...].astype(jnp.bfloat16)
    h1 = jnp.dot(x, w1_ref[...], preferred_element_type=jnp.float32)
    h1 = jnp.maximum(h1 + b1_ref[...], 0.0)

    # Layer 2: (TB, 512) @ (512, 384) -> f32 acc; bias + ReLU in f32.
    h2 = jnp.dot(h1.astype(jnp.bfloat16), w2_ref[...],
                 preferred_element_type=jnp.float32)
    h2 = jnp.maximum(h2 + b2_ref[...], 0.0)

    # Layer 3: (TB, 384) @ (384, 128) -> f32 acc; bias + maxAction * tanh.
    h3 = jnp.dot(h2.astype(jnp.bfloat16), w3_ref[...],
                 preferred_element_type=jnp.float32)
    o_ref[...] = (max_action * jnp.tanh(h3 + b3_ref[...])).astype(o_ref.dtype)


def prepare_params(params):
    """One-time weight prep: transpose already done, pad lanes to 128, bf16 cast.

    Biases stay f32 (tiny; VPU epilogue is f32). Padding is exact (see header).
    """
    w1, b1 = params["w1"], params["b1"]
    w2, b2 = params["w2"], params["b2"]
    w3, b3 = params["w3"], params["b3"]
    action_dim = w3.shape[1]
    h1p = _round_up(w1.shape[1], 128)      # 400 -> 512
    h2p = _round_up(w2.shape[1], 128)      # 300 -> 384
    ap = _round_up(action_dim, 128)        # 8   -> 128

    def pad2(a, rows, cols):
        return jnp.pad(a, ((0, rows - a.shape[0]), (0, cols - a.shape[1])))

    return {
        "w1": pad2(w1, w1.shape[0], h1p).astype(jnp.bfloat16),
        "b1": pad2(b1, 1, h1p).astype(jnp.float32),
        "w2": pad2(w2, h1p, h2p).astype(jnp.bfloat16),
        "b2": pad2(b2, 1, h2p).astype(jnp.float32),
        "w3": pad2(w3, h2p, ap).astype(jnp.bfloat16),
        "b3": pad2(b3, 1, ap).astype(jnp.float32),
        "action_dim": action_dim,
    }


def actor_forward(x, prepared, max_action=MAX_ACTION, block_b=512):
    """x: (B, state) f32. prepared: output of prepare_params. Returns (B, action) f32."""
    w1, b1 = prepared["w1"], prepared["b1"]
    w2, b2 = prepared["w2"], prepared["b2"]
    w3, b3 = prepared["w3"], prepared["b3"]
    action_dim = prepared["action_dim"]

    B, S = x.shape
    H1 = w1.shape[1]
    H2 = w2.shape[1]
    AP = w3.shape[1]

    # Batch tile: multiple of 8 sublanes, capped at block_b; pad B so every
    # grid step sees a full tile (no partial-block masking).
    TB = min(block_b, _round_up(B, 8))
    B_pad = _round_up(B, TB)
    if B_pad != B:
        x = jnp.pad(x, ((0, B_pad - B), (0, 0)))

    grid = (B_pad // TB,)
    kernel = functools.partial(_actor_kernel, max_action=float(max_action))

    flops = int(2 * B_pad * (S * H1 + H1 * H2 + H2 * AP))
    bytes_accessed = int(
        B_pad * S * 4                              # x (f32)
        + (w1.size + w2.size + w3.size) * 2        # weights (bf16)
        + (b1.size + b2.size + b3.size) * 4        # biases (f32)
        + B_pad * AP * 4)                          # out (f32)

    out = pl.pallas_call(
        kernel,
        out_shape=jax.ShapeDtypeStruct((B_pad, AP), jnp.float32),
        grid_spec=pltpu.PrefetchScalarGridSpec(
            num_scalar_prefetch=0,
            grid=grid,
            in_specs=[
                pl.BlockSpec((TB, S), lambda i: (i, 0)),     # x: tiled over batch
                pl.BlockSpec((S, H1), lambda i: (0, 0)),     # weights/biases:
                pl.BlockSpec((1, H1), lambda i: (0, 0)),     # constant block ->
                pl.BlockSpec((H1, H2), lambda i: (0, 0)),    # VMEM-resident
                pl.BlockSpec((1, H2), lambda i: (0, 0)),     # across grid steps
                pl.BlockSpec((H2, AP), lambda i: (0, 0)),
                pl.BlockSpec((1, AP), lambda i: (0, 0)),
            ],
            out_specs=pl.BlockSpec((TB, AP), lambda i: (i, 0)),
        ),
        compiler_params=pltpu.CompilerParams(
            dimension_semantics=("parallel",),
        ),
        cost_estimate=pl.CostEstimate(
            flops=flops,
            transcendentals=int(B_pad * AP),
            bytes_accessed=bytes_accessed,
        ),
    )(x, w1, b1, w2, b2, w3, b3)

    # Drop batch padding and the zero-padded action lanes.
    return out[:B, :action_dim]


def init_params(key, state_dim=STATE_DIM, action_dim=ACTION_DIM):
    """Deterministic init mimicking PyTorch Linear default (U[-1/sqrt(fan_in), +])."""
    ks = jax.random.split(key, 6)

    def lin(kw, kb, fan_in, fan_out):
        bound = 1.0 / jnp.sqrt(float(fan_in))
        w = jax.random.uniform(kw, (fan_in, fan_out), jnp.float32, -bound, bound)
        b = jax.random.uniform(kb, (1, fan_out), jnp.float32, -bound, bound)
        return w, b

    w1, b1 = lin(ks[0], ks[1], state_dim, HIDDEN1)
    w2, b2 = lin(ks[2], ks[3], HIDDEN1, HIDDEN2)
    w3, b3 = lin(ks[4], ks[5], HIDDEN2, action_dim)
    return {"w1": w1, "b1": b1, "w2": w2, "b2": b2, "w3": w3, "b3": b3}


def actor_reference(x, params, max_action=MAX_ACTION):
    """Pure-f32 reference with the original (unquantized) parameters."""
    h1 = jnp.maximum(x @ params["w1"] + params["b1"], 0.0)
    h2 = jnp.maximum(h1 @ params["w2"] + params["b2"], 0.0)
    return max_action * jnp.tanh(h2 @ params["w3"] + params["b3"])


if __name__ == "__main__":
    key = jax.random.PRNGKey(0)
    k_params, k_x = jax.random.split(key)

    batch = 2
    params = init_params(k_params)
    prepared = prepare_params(params)
    x = jax.random.normal(k_x, (batch, STATE_DIM), jnp.float32)

    out = actor_forward(x, prepared)
    out = jax.block_until_ready(out)

    ref = actor_reference(x, params)
    assert out.shape == (batch, ACTION_DIM), out.shape
    # bf16 weight/activation quantization inside the kernel vs the f32
    # reference introduces ~1e-3-level deviation on this tanh-bounded policy.
    assert jnp.allclose(out, ref, atol=2e-2, rtol=2e-2), (
        "mismatch vs reference: max abs err = "
        f"{float(jnp.max(jnp.abs(out - ref)))}")

    print("KERNEL_OK")
</pallas_src>

<mosaic_0001>
module attributes {stable_mosaic.version = 11 : i64} {
  func.func @_actor_kernel(%arg0: i32, %arg1: memref<8x28xf32, #tpu.memory_space<vmem>>, %arg2: memref<28x512xbf16, #tpu.memory_space<vmem>>, %arg3: memref<1x512xf32, #tpu.memory_space<vmem>>, %arg4: memref<512x384xbf16, #tpu.memory_space<vmem>>, %arg5: memref<1x384xf32, #tpu.memory_space<vmem>>, %arg6: memref<384x128xbf16, #tpu.memory_space<vmem>>, %arg7: memref<1x128xf32, #tpu.memory_space<vmem>>, %arg8: memref<8x128xf32, #tpu.memory_space<vmem>>) attributes {dimension_semantics = [#tpu.dimension_semantics<parallel>], iteration_bounds = array<i64: 1>, scalar_prefetch = 0 : i64, scratch_operands = 0 : i64, tpu.core_type = #tpu.core_type<tc>, window_params = [{transform_indices = @transform_0, window_bounds = array<i64: 8, 28>}, {pipeline_mode = #tpu.pipeline_mode<synchronous>, transform_indices = @transform_1, window_bounds = array<i64: 28, 512>}, {pipeline_mode = #tpu.pipeline_mode<synchronous>, transform_indices = @transform_2, window_bounds = array<i64: 1, 512>}, {pipeline_mode = #tpu.pipeline_mode<synchronous>, transform_indices = @transform_3, window_bounds = array<i64: 512, 384>}, {pipeline_mode = #tpu.pipeline_mode<synchronous>, transform_indices = @transform_4, window_bounds = array<i64: 1, 384>}, {pipeline_mode = #tpu.pipeline_mode<synchronous>, transform_indices = @transform_5, window_bounds = array<i64: 384, 128>}, {pipeline_mode = #tpu.pipeline_mode<synchronous>, transform_indices = @transform_6, window_bounds = array<i64: 1, 128>}, {transform_indices = @transform_7, window_bounds = array<i64: 8, 128>}]} {
    %c0 = arith.constant 0 : index
    %c0_0 = arith.constant 0 : index
    %0 = vector.load %arg1[%c0, %c0_0] : memref<8x28xf32, #tpu.memory_space<vmem>>, vector<8x28xf32>
    %1 = arith.truncf %0 : vector<8x28xf32> to vector<8x28xbf16>
    %c0_1 = arith.constant 0 : index
    %c0_2 = arith.constant 0 : index
    %2 = vector.load %arg2[%c0_1, %c0_2] : memref<28x512xbf16, #tpu.memory_space<vmem>>, vector<28x512xbf16>
    %cst = arith.constant dense<0.000000e+00> : vector<8x512xf32>
    %3 = tpu.matmul %1, %2, %cst {dimension_numbers = #tpu.dot_dimension_numbers<[1], [0], [0], [1], [0, 0, 1, 1], [], []>} : vector<8x28xbf16>, vector<28x512xbf16>, vector<8x512xf32> -> vector<8x512xf32>
    %c0_3 = arith.constant 0 : index
    %c0_4 = arith.constant 0 : index
    %4 = vector.load %arg3[%c0_3, %c0_4] : memref<1x512xf32, #tpu.memory_space<vmem>>, vector<1x512xf32>
    %5 = vector.broadcast %4 : vector<1x512xf32> to vector<8x512xf32>
    %6 = arith.addf %3, %5 : vector<8x512xf32>
    %cst_5 = arith.constant 0.000000e+00 : f32
    %7 = vector.broadcast %cst_5 : f32 to vector<8x512xf32>
    %8 = arith.maximumf %6, %7 : vector<8x512xf32>
    %9 = arith.truncf %8 : vector<8x512xf32> to vector<8x512xbf16>
    %c0_6 = arith.constant 0 : index
    %c0_7 = arith.constant 0 : index
    %10 = vector.load %arg4[%c0_6, %c0_7] : memref<512x384xbf16, #tpu.memory_space<vmem>>, vector<512x384xbf16>
    %cst_8 = arith.constant dense<0.000000e+00> : vector<8x384xf32>
    %11 = tpu.matmul %9, %10, %cst_8 {dimension_numbers = #tpu.dot_dimension_numbers<[1], [0], [0], [1], [0, 0, 1, 1], [], []>} : vector<8x512xbf16>, vector<512x384xbf16>, vector<8x384xf32> -> vector<8x384xf32>
    %c0_9 = arith.constant 0 : index
    %c0_10 = arith.constant 0 : index
    %12 = vector.load %arg5[%c0_9, %c0_10] : memref<1x384xf32, #tpu.memory_space<vmem>>, vector<1x384xf32>
    %13 = vector.broadcast %12 : vector<1x384xf32> to vector<8x384xf32>
    %14 = arith.addf %11, %13 : vector<8x384xf32>
    %cst_11 = arith.constant 0.000000e+00 : f32
    %15 = vector.broadcast %cst_11 : f32 to vector<8x384xf32>
    %16 = arith.maximumf %14, %15 : vector<8x384xf32>
    %17 = arith.truncf %16 : vector<8x384xf32> to vector<8x384xbf16>
    %c0_12 = arith.constant 0 : index
    %c0_13 = arith.constant 0 : index
    %18 = vector.load %arg6[%c0_12, %c0_13] : memref<384x128xbf16, #tpu.memory_space<vmem>>, vector<384x128xbf16>
    %cst_14 = arith.constant dense<0.000000e+00> : vector<8x128xf32>
    %19 = tpu.matmul %17, %18, %cst_14 {dimension_numbers = #tpu.dot_dimension_numbers<[1], [0], [0], [1], [0, 0, 1, 1], [], []>} : vector<8x384xbf16>, vector<384x128xbf16>, vector<8x128xf32> -> vector<8x128xf32>
    %c0_15 = arith.constant 0 : index
    %c0_16 = arith.constant 0 : index
    %20 = vector.load %arg7[%c0_15, %c0_16] : memref<1x128xf32, #tpu.memory_space<vmem>>, vector<1x128xf32>
    %21 = vector.broadcast %20 : vector<1x128xf32> to vector<8x128xf32>
    %22 = arith.addf %19, %21 : vector<8x128xf32>
    %23 = math.tanh %22 : vector<8x128xf32>
    %cst_17 = arith.constant 1.000000e+00 : f32
    %24 = vector.broadcast %cst_17 : f32 to vector<8x128xf32>
    %25 = arith.mulf %24, %23 : vector<8x128xf32>
    %c0_18 = arith.constant 0 : index
    %c0_19 = arith.constant 0 : index
    %26 = vector.load %arg8[%c0_18, %c0_19] : memref<8x128xf32, #tpu.memory_space<vmem>>, vector<8x128xf32>
    tpu.vector_store %arg8[%c0_18, %c0_19], %25 {strides = array<i32>} : memref<8x128xf32, #tpu.memory_space<vmem>>, vector<8x128xf32>,
    return
  }
  func.func @transform_0(%arg0: i32) -> (i32, i32) {
    %c0_i32 = arith.constant 0 : i32
    %c0_i32_0 = arith.constant 0 : i32
    return %arg0, %c0_i32 : i32, i32
  }
  func.func @transform_1(%arg0: i32) -> (i32, i32) {
    %c0_i32 = arith.constant 0 : i32
    %c0_i32_0 = arith.constant 0 : i32
    %c0_i32_1 = arith.constant 0 : i32
    return %c0_i32, %c0_i32_0 : i32, i32
  }
  func.func @transform_2(%arg0: i32) -> (i32, i32) {
    %c0_i32 = arith.constant 0 : i32
    %c0_i32_0 = arith.constant 0 : i32
    %c0_i32_1 = arith.constant 0 : i32
    return %c0_i32, %c0_i32_0 : i32, i32
  }
  func.func @transform_3(%arg0: i32) -> (i32, i32) {
    %c0_i32 = arith.constant 0 : i32
    %c0_i32_0 = arith.constant 0 : i32
    %c0_i32_1 = arith.constant 0 : i32
    return %c0_i32, %c0_i32_0 : i32, i32
  }
  func.func @transform_4(%arg0: i32) -> (i32, i32) {
    %c0_i32 = arith.constant 0 : i32
    %c0_i32_0 = arith.constant 0 : i32
    %c0_i32_1 = arith.constant 0 : i32
    return %c0_i32, %c0_i32_0 : i32, i32
  }
  func.func @transform_5(%arg0: i32) -> (i32, i32) {
    %c0_i32 = arith.constant 0 : i32
    %c0_i32_0 = arith.constant 0 : i32
    %c0_i32_1 = arith.constant 0 : i32
    return %c0_i32, %c0_i32_0 : i32, i32
  }
  func.func @transform_6(%arg0: i32) -> (i32, i32) {
    %c0_i32 = arith.constant 0 : i32
    %c0_i32_0 = arith.constant 0 : i32
    %c0_i32_1 = arith.constant 0 : i32
    return %c0_i32, %c0_i32_0 : i32, i32
  }
  func.func @transform_7(%arg0: i32) -> (i32, i32) {
    %c0_i32 = arith.constant 0 : i32
    %c0_i32_0 = arith.constant 0 : i32
    return %arg0, %c0_i32 : i32, i32
  }
}

</mosaic_0001>

<bundles_post_ra>
// kernel: tpu_custom_call.1
= control target key start
LH: loop header
LB: loop body
LE: loop exit
PB: predicated region body
PF: predicated region fallthrough
CT: control target
= control target key end

     0   :  { %12 = vsyncpa [#allocation3], 0  ;;  %s2032_s0 = inlined_call_operand.hbm [shape: f32[8,28], index: 0, kind: input, shape index: {}]   ;;  %s2033_s1 = inlined_call_operand.hbm [shape: bf16[28,512], index: 1, kind: input, shape index: {}]   ;;  %s2034_s2 = inlined_call_operand.hbm [shape: f32[1,512], index: 2, kind: input, shape index: {}]   ;;  %s2035_s3 = inlined_call_operand.hbm [shape: bf16[512,384], index: 3, kind: input, shape index: {}]   ;;  %s2036_s4 = inlined_call_operand.vmem [shape: f32[1,384], index: 4, kind: input, shape index: {}]   ;;  %s2037_s5 = inlined_call_operand.hbm [shape: bf16[384,128], index: 5, kind: input, shape index: {}]   ;;  %s2038_s6 = inlined_call_operand.vmem [shape: f32[1,128], index: 6, kind: input, shape index: {}]   ;;  %s2039_s7 = inlined_call_operand.hbm [shape: f32[8,128], index: 7, kind: output, shape index: {}]  }
   0x1   :  { %13 = vsyncpa [#allocation6], 0 }
   0x2   :  { %14 = vsyncpa [#allocation9], 0 }
   0x3   :  { %15 = vsyncpa [#allocation4], 0  ;;  %s1927_s24 = smov [#allocation5]  }
   0x4   :  { %s31_s25 = sshll.u32 %s1927_s24, 4  ;;  %s32_s25 = int_to_ptr.vmem [resolvable:$true] %s31_s25 }
   0x5   :  { %s1807_s26 = scalar_lea.vmem %s32_s25, 1024  ;;  %p1812_p1 = scmp.lt.s32.totalorder %s32_s25, %s32_s25 }
   0x6   :  { %p1808_p0 = scmp.ne.s32.totalorder %s32_s25, %s1807_s26  ;;  %p1813_p2 = scmp.lt.s32.totalorder %s1807_s26, %s1807_s26 }
   0x8   :  { %p1814_p3 = por %p1813_p2, %p1812_p1 }
   0xa   :  { %p1815_p4 = pnand %p1814_p3, %p1808_p0 }
   0xc   :  { %1818 = shalt.err (!%p1815_p4)
}
   0xd   :  { %s1928_s27 = smov 256   ;;  %s1929_s28 = smov 16  }
   0xe   :  { %37 = dma.hbm_to_vmem [thread:$0]  %s2033_s1, 1024, %s32_s25, [#allocation6], %s1928_s27, %s1928_s27, %s1929_s28  }
   0xf   :  { %s1930_s8 = smov [#allocation8]  }
  0x10   :  { %s53_s9 = sshll.u32 %s1930_s8, 4  ;;  %s54_s9 = int_to_ptr.vmem [resolvable:$true] %s53_s9 }
  0x11   :  { %s1827_s10 = scalar_lea.vmem %s54_s9, 12288  ;;  %p1832_p6 = scmp.lt.s32.totalorder %s54_s9, %s54_s9 }
  0x12   :  { %p1828_p5 = scmp.ne.s32.totalorder %s54_s9, %s1827_s10  ;;  %p1833_p7 = scmp.lt.s32.totalorder %s1827_s10, %s1827_s10 }
  0x14   :  { %p1834_p8 = por %p1833_p7, %p1832_p6 }
  0x16   :  { %p1835_p9 = pnand %p1834_p8, %p1828_p5 }
  0x18   :  { %1838 = shalt.err (!%p1835_p9)
}
  0x19   :  { %s1931_s11 = smov 192   ;;  %s1932_s12 = smov 12  }
  0x1a   :  { %59 = dma.hbm_to_vmem [thread:$0]  %s2035_s3, 12288, %s54_s9, [#allocation9], %s1931_s11, %s1931_s11, %s1932_s12  }
  0x1b   :  { %s1933_s15 = smov [#allocation2]   ;;  %s1934_s17 = smov [#allocation7]  }
  0x1c   :  { %s22_s16 = sshll.u32 %s1933_s15, 4  ;;  %s44_s1 = sshll.u32 %s1934_s17, 4  ;;  %s23_s16 = int_to_ptr.vmem [resolvable:$true] %s22_s16  ;;  %s45_s1 = int_to_ptr.vmem [resolvable:$true] %s44_s1 }
  0x1d   :  { %s1847_s18 = scalar_lea.vmem %s23_s16, 128  ;;  %p1852_p11 = scmp.lt.s32.totalorder %s23_s16, %s23_s16 }
  0x1e   :  { %p1848_p10 = scmp.ne.s32.totalorder %s23_s16, %s1847_s18  ;;  %p1853_p12 = scmp.lt.s32.totalorder %s1847_s18, %s1847_s18 }
  0x20   :  { %p1854_p13 = por %p1853_p12, %p1852_p11 }
  0x22   :  { %p1855_p0 = pnand %p1854_p13, %p1848_p10 }
  0x24   :  { %1858 = shalt.err (!%p1855_p0)
}
  0x25   :  { %25 = dma.hbm_to_vmem [thread:$0]  %s2032_s0, 128, %s23_s16, [#allocation3]  }
  0x26   :  { %s1867_s21 = scalar_lea.vmem %s45_s1, 64  ;;  %p1872_p2 = scmp.lt.s32.totalorder %s45_s1, %s45_s1 }
  0x27   :  { %p1868_p1 = scmp.ne.s32.totalorder %s45_s1, %s1867_s21  ;;  %p1873_p3 = scmp.lt.s32.totalorder %s1867_s21, %s1867_s21 }
  0x29   :  { %p1874_p4 = por %p1873_p3, %p1872_p2 }
  0x2b   :  { %p1875_p5 = pnand %p1874_p4, %p1868_p1 }
  0x2d   :  { %1878 = shalt.err (!%p1875_p5)
}
  0x2e   :  { %47 = dma.hbm_to_vmem [thread:$0]  %s2034_s2, 64, %s45_s1, [#allocation6]  }
  0x2f   :  { %s1935_s23 = smov [#allocation10]  }
  0x30   :  { %s67_s24 = sshll.u32 %s1935_s23, 4  ;;  %s68_s24 = int_to_ptr.vmem [resolvable:$true] %s67_s24 }
  0x31   :  { %s1887_s25 = scalar_lea.vmem %s68_s24, 3072  ;;  %p1892_p7 = scmp.lt.s32.totalorder %s68_s24, %s68_s24 }
  0x32   :  { %p1888_p6 = scmp.ne.s32.totalorder %s68_s24, %s1887_s25  ;;  %p1893_p8 = scmp.lt.s32.totalorder %s1887_s25, %s1887_s25 }
  0x34   :  { %p1894_p9 = por %p1893_p8, %p1892_p7 }
  0x36   :  { %p1895_p10 = pnand %p1894_p9, %p1888_p6 }
  0x38   :  { %1898 = shalt.err (!%p1895_p10)
}
  0x39   :  { %s1936_s0 = smov 64   ;;  %s1937_s26 = smov 4  }
  0x3a   :  { %73 = dma.hbm_to_vmem [thread:$0]  %s2037_s5, 3072, %s68_s24, [#allocation9], %s1936_s0, %s1936_s0, %s1937_s26  }
  0x3b   :  { %1919 = dma.done.wait [#allocation3], 128  }
  0x3c   :  { %1920 = vsyncadd [#allocation3], 4294967168 }
  0x3d   :  { %1921 = dma.done.wait [#allocation6], 1088  }
  0x3e   :  { %1922 = vsyncadd [#allocation6], 4294966208 }
  0x3f   :  { %1923 = dma.done.wait [#allocation9], 15360  }
  0x40   :  { %1924 = vsyncadd [#allocation9], 4294951936  ;;  %v1938_v0 = vmov 0   ;;  %vm164_vm0 = vcmask 1045504   ;;  %v1639_v5 = vld [vmem:[#allocation5 + $0x4] ss:$16 sps:$4 sm:$0xff]  }
  0x41   :  { %209 = vmatprep.mubr.bf16.mxu0 %v1938_v0  ;;  %250 = vmatprep.mubr.bf16.mxu1 %v1938_v0  ;;  %v1633_v1 = vld [vmem:[#allocation5 + $0x24] ss:$16 sps:$4 sm:$0x3f]   ;;  %v1635_v2 = vld [vmem:[#allocation5 + $0x2c] ss:$16 sps:$4 sm:$0x3f]  }
  0x42   :  { %1398 = vmatprep.subr.msk.bf16.mxu0 %vm164_vm0, %v1633_v1  ;;  %v1637_v3 = vld [vmem:[#allocation5 + $0x20] ss:$16 sps:$4 sm:$0x3f]   ;;  %v1638_v4 = vld [vmem:[#allocation5 + $0x28] ss:$16 sps:$4 sm:$0x3f]   ;;  %1400 = vmatprep.subr.msk.bf16.mxu1 %vm164_vm0, %v1635_v2 }
  0x43   :  { %v166_v6 = vsel %vm164_vm0, %v1637_v3, 0  ;;  %v172_v7 = vsel %vm164_vm0, %v1638_v4, 0  ;;  %v1641_v8 = vld [vmem:[#allocation5 + $0xc] ss:$16 sps:$4 sm:$0xff]   ;;  %v1643_v9 = vld [vmem:[#allocation5] ss:$16 sps:$4 sm:$0xff]  }
  0x44   :  { %190 = vmatpush1.bf16.msra.mxu0 %v166_v6  ;;  %231 = vmatpush1.bf16.msra.mxu1 %v172_v7  ;;  %v1644_v10 = vld [vmem:[#allocation5 + $0x8] ss:$16 sps:$4 sm:$0xff]   ;;  %v1647_v12 = vld [vmem:[#allocation8 + $0xac] ss:$12 sps:$4 sm:$0xff]   ;;  %vm160_vm1 = vcmask 228352   ;;  %vm1940_vm2 = vmmov 0  }
  0x45   :  { %v92_v11 = vld [vmem:[#allocation2] sm:$0xff]  ;;  %191 = vmatprep.subr.bf16.mxu0 %v1639_v5  ;;  %232 = vmatprep.subr.bf16.mxu1 %v1641_v8  ;;  %v1651_v19 = vld [vmem:[#allocation8 + $0x90] ss:$12 sps:$4 sm:$0xff]   ;;  %v1663_v27 = vld [vmem:[#allocation8 + $0x60] ss:$12 sps:$4 sm:$0xff]   ;;  %s1941_s30 = smov [#allocation11]  }
  0x46   :  { %v93_v13 = vpack.c.bf16 %v92_v11, %v92_v11  ;;  %v1650_v14 = vld [vmem:[#allocation8 + $0x22c] ss:$12 sps:$4 sm:$0xff]   ;;  %v1645_v15 = vld [vmem:[#allocation8 + $0xa8] ss:$12 sps:$4 sm:$0xff]   ;;  %v1654_v20 = vld [vmem:[#allocation8 + $0x210] ss:$12 sps:$4 sm:$0xff]  }
  0x47   :  { %v1648_v16 = vld [vmem:[#allocation8 + $0x228] ss:$12 sps:$4 sm:$0xff]   ;;  %v1657_v23 = vld [vmem:[#allocation8 + $0x78] ss:$12 sps:$4 sm:$0xff]   ;;  %v1666_v28 = vld [vmem:[#allocation8 + $0x1e0] ss:$12 sps:$4 sm:$0xff]  }
  0x48   :  { %192 = vmatpush1.bf16.msra.mxu0 %v1643_v9  ;;  %233 = vmatpush1.bf16.msra.mxu1 %v1644_v10  ;;  %v1653_v17 = vld [vmem:[#allocation8 + $0x94] ss:$12 sps:$4 sm:$0xff]   ;;  %v1659_v21 = vld [vmem:[#allocation8 + $0x7c] ss:$12 sps:$4 sm:$0xff]   ;;  %v1660_v24 = vld [vmem:[#allocation8 + $0x1f8] ss:$12 sps:$4 sm:$0xff]  }
  0x49   :  { %924 = vmatprep.subr.bf16.mxu0 %v1647_v12  ;;  %965 = vmatprep.subr.bf16.mxu1 %v1650_v14  ;;  %v1656_v18 = vld [vmem:[#allocation8 + $0x214] ss:$12 sps:$4 sm:$0xff]   ;;  %v1662_v22 = vld [vmem:[#allocation8 + $0x1fc] ss:$12 sps:$4 sm:$0xff]   ;;  %v1665_v25 = vld [vmem:[#allocation8 + $0x64] ss:$12 sps:$4 sm:$0xff]  }
  0x4a   :  { %v1668_v26 = vld [vmem:[#allocation8 + $0x1e4] ss:$12 sps:$4 sm:$0xff]   ;;  %v1671_v29 = vld [vmem:[#allocation8 + $0x4c] ss:$12 sps:$4 sm:$0xff]   ;;  %v1669_v31 = vld [vmem:[#allocation8 + $0x48] ss:$12 sps:$4 sm:$0xff]  }
  0x4b   :  { %1399 = vmatmul.mubr.msk.bf16.vlgmr.msra.gmra.mxu0 %vm160_vm1, %v93_v13  ;;  %1401 = vmatmul.mubr.msk.bf16.vlgmr.msra.gmra.mxu1 %vm160_vm1, %v93_v13  ;;  %v1674_v30 = vld [vmem:[#allocation8 + $0x1cc] ss:$12 sps:$4 sm:$0xff]   ;;  %v1672_v32 = vld [vmem:[#allocation8 + $0x1c8] ss:$12 sps:$4 sm:$0xff]   ;;  %v1675_v35 = vld [vmem:[#allocation8 + $0x30] ss:$12 sps:$4 sm:$0xff]  }
  0x4c   :  { %925 = vmatpush1.bf16.msra.mxu0 %v1645_v15  ;;  %966 = vmatpush1.bf16.msra.mxu1 %v1648_v16  ;;  %v1677_v33 = vld [vmem:[#allocation8 + $0x34] ss:$12 sps:$4 sm:$0xff]   ;;  %v1678_v36 = vld [vmem:[#allocation8 + $0x1b0] ss:$12 sps:$4 sm:$0xff]   ;;  %v1681_v39 = vld [vmem:[#allocation8 + $0x18] ss:$12 sps:$4 sm:$0xff]   ;;  %v104_v15 = vlaneseq }
  0x4d   :  { %926 = vmatprep.subr.bf16.mxu0 %v1653_v17  ;;  %967 = vmatprep.subr.bf16.mxu1 %v1656_v18  ;;  %v1680_v34 = vld [vmem:[#allocation8 + $0x1b4] ss:$12 sps:$4 sm:$0xff]   ;;  %v1683_v37 = vld [vmem:[#allocation8 + $0x1c] ss:$12 sps:$4 sm:$0xff]   ;;  %v1684_v40 = vld [vmem:[#allocation8 + $0x198] ss:$12 sps:$4 sm:$0xff]  }
  0x4e   :  { %v1686_v38 = vld [vmem:[#allocation8 + $0x19c] ss:$12 sps:$4 sm:$0xff]   ;;  %v1689_v41 = vld [vmem:[#allocation8 + $0x4] ss:$12 sps:$4 sm:$0xff]   ;;  %v1687_v43 = vld [vmem:[#allocation8] ss:$12 sps:$4 sm:$0xff]  }
  0x4f   :  { %v1692_v42 = vld [vmem:[#allocation8 + $0x184] ss:$12 sps:$4 sm:$0xff]   ;;  %v1690_v44 = vld [vmem:[#allocation8 + $0x180] ss:$12 sps:$4 sm:$0xff]   ;;  %v1693_v47 = vld [vmem:[#allocation8 + $0x168] ss:$12 sps:$4 sm:$0xff]  }
  0x50   :  { %927 = vmatpush1.bf16.msra.mxu0 %v1651_v19  ;;  %968 = vmatpush1.bf16.msra.mxu1 %v1654_v20  ;;  %v1695_v45 = vld [vmem:[#allocation8 + $0x16c] ss:$12 sps:$4 sm:$0xff]   ;;  %v1696_v48 = vld [vmem:[#allocation8 + $0x2e8] ss:$12 sps:$4 sm:$0xff]   ;;  %v1699_v51 = vld [vmem:[#allocation8 + $0x150] ss:$12 sps:$4 sm:$0xff]  }
  0x51   :  { %928 = vmatprep.subr.bf16.mxu0 %v1659_v21  ;;  %969 = vmatprep.subr.bf16.mxu1 %v1662_v22  ;;  %v1698_v46 = vld [vmem:[#allocation8 + $0x2ec] ss:$12 sps:$4 sm:$0xff]   ;;  %v1701_v49 = vld [vmem:[#allocation8 + $0x154] ss:$12 sps:$4 sm:$0xff]   ;;  %v1702_v52 = vld [vmem:[#allocation8 + $0x2d0] ss:$12 sps:$4 sm:$0xff]  }
  0x52   :  { %v1704_v50 = vld [vmem:[#allocation8 + $0x2d4] ss:$12 sps:$4 sm:$0xff]   ;;  %v1707_v53 = vld [vmem:[#allocation8 + $0x13c] ss:$12 sps:$4 sm:$0xff]   ;;  %v1705_v55 = vld [vmem:[#allocation8 + $0x138] ss:$12 sps:$4 sm:$0xff]  }
  0x53   :  { %v1710_v54 = vld [vmem:[#allocation8 + $0x2bc] ss:$12 sps:$4 sm:$0xff]   ;;  %v1708_v56 = vld [vmem:[#allocation8 + $0x2b8] ss:$12 sps:$4 sm:$0xff]   ;;  %v1711_v59 = vld [vmem:[#allocation8 + $0x120] ss:$12 sps:$4 sm:$0xff]  }
  0x54   :  { %929 = vmatpush1.bf16.msra.mxu0 %v1657_v23  ;;  %970 = vmatpush1.bf16.msra.mxu1 %v1660_v24  ;;  %v1713_v57 = vld [vmem:[#allocation8 + $0x124] ss:$12 sps:$4 sm:$0xff]   ;;  %v1714_v60 = vld [vmem:[#allocation8 + $0x2a0] ss:$12 sps:$4 sm:$0xff]   ;;  %v1717_v63 = vld [vmem:[#allocation8 + $0x108] ss:$12 sps:$4 sm:$0xff]  }
  0x55   :  { %930 = vmatprep.subr.bf16.mxu0 %v1665_v25  ;;  %971 = vmatprep.subr.bf16.mxu1 %v1668_v26  ;;  %v1716_v58 = vld [vmem:[#allocation8 + $0x2a4] ss:$12 sps:$4 sm:$0xff]   ;;  %v1719_v61 = vld [vmem:[#allocation8 + $0x10c] ss:$12 sps:$4 sm:$0xff]   ;;  %v1720_v0 = vld [vmem:[#allocation8 + $0x288] ss:$12 sps:$4 sm:$0xff]  }
  0x56   :  { %v1722_v62 = vld [vmem:[#allocation8 + $0x28c] ss:$12 sps:$4 sm:$0xff]   ;;  %v1725_v1 = vld [vmem:[#allocation8 + $0xf4] ss:$12 sps:$4 sm:$0xff]   ;;  %v1723_v3 = vld [vmem:[#allocation8 + $0xf0] ss:$12 sps:$4 sm:$0xff]  }
  0x57   :  { %v1728_v2 = vld [vmem:[#allocation8 + $0x274] ss:$12 sps:$4 sm:$0xff]   ;;  %v1726_v4 = vld [vmem:[#allocation8 + $0x270] ss:$12 sps:$4 sm:$0xff]   ;;  %v1729_v7 = vld [vmem:[#allocation8 + $0xd8] ss:$12 sps:$4 sm:$0xff]  }
  0x58   :  { %931 = vmatpush1.bf16.msra.mxu0 %v1663_v27  ;;  %972 = vmatpush1.bf16.msra.mxu1 %v1666_v28  ;;  %v1731_v5 = vld [vmem:[#allocation8 + $0xdc] ss:$12 sps:$4 sm:$0xff]   ;;  %v1732_v8 = vld [vmem:[#allocation8 + $0x258] ss:$12 sps:$4 sm:$0xff]   ;;  %v1735_v11 = vld [vmem:[#allocation8 + $0xc0] ss:$12 sps:$4 sm:$0xff]  }
  0x59   :  { %932 = vmatprep.subr.bf16.mxu0 %v1671_v29  ;;  %973 = vmatprep.subr.bf16.mxu1 %v1674_v30  ;;  %v1734_v6 = vld [vmem:[#allocation8 + $0x25c] ss:$12 sps:$4 sm:$0xff]   ;;  %v1737_v9 = vld [vmem:[#allocation8 + $0xc4] ss:$12 sps:$4 sm:$0xff]   ;;  %v1738_v12 = vld [vmem:[#allocation8 + $0x240] ss:$12 sps:$4 sm:$0xff]  }
  0x5a   :  { %v1740_v10 = vld [vmem:[#allocation8 + $0x244] ss:$12 sps:$4 sm:$0xff]   ;;  %v1997_v16 = vshrl.u32 %v104_v15, 7  ;;  %v102_v19 = vld [vmem:[#allocation7] sm:$0xf]  ;;  %s1379_s8 = sshll.u32 %s1941_s30, 4  ;;  %s1380_s8 = int_to_ptr.vmem [resolvable:$true] %s1379_s8 }
  0x5b   :  { %v1741_v13 = vld [vmem:[#allocation8 + $0x170] ss:$12 sps:$4 sm:$0xff]   ;;  %s1899_s9 = scalar_lea.vmem %s1380_s8, 128  ;;  %p1904_p12 = scmp.lt.s32.totalorder %s1380_s8, %s1380_s8 }
  0x5c   :  { %933 = vmatpush1.bf16.msra.mxu0 %v1669_v31  ;;  %974 = vmatpush1.bf16.msra.mxu1 %v1672_v32  ;;  %v1742_v14 = vld [vmem:[#allocation8 + $0x2f0] ss:$12 sps:$4 sm:$0xff]   ;;  %v106_v17 = vsub.s32 0, %v1997_v16  ;;  %v114_v18 = vsub.s32 2, %v1997_v16  ;;  %v110_v20 = vsub.s32 1, %v1997_v16  ;;  %v118_v21 = vsub.s32 3, %v1997_v16  ;;  %p1900_p11 = scmp.ne.s32.totalorder %s1380_s8, %s1899_s9  ;;  %p1905_p13 = scmp.lt.s32.totalorder %s1899_s9, %s1899_s9 }
  0x5d   :  { %934 = vmatprep.subr.bf16.mxu0 %v1677_v33  ;;  %975 = vmatprep.subr.bf16.mxu1 %v1680_v34  ;;  %v1776_v15 = vld [vmem:[#allocation10 + $0x30] sm:$0xff]  }
  0x5e   :  { %v107_v22 = vrot.slane %v102_v19, %v106_v17  ;;  %v115_v23 = vrot.slane %v102_v19, %v114_v18  ;;  %v111_v24 = vrot.slane %v102_v19, %v110_v20  ;;  %v119_v25 = vrot.slane %v102_v19, %v118_v21  ;;  %v1777_v19 = vld [vmem:[#allocation10 + $0x68] sm:$0xff]   ;;  %v1498_v16 = vld [vmem:[%s2038_s6] ss:$0 sm:$0xff]  ;;  %p1906_p0 = por %p1905_p13, %p1904_p12 }
  0x5f   :  { %v1778_v21 = vld [vmem:[#allocation10 + $0x28] sm:$0xff]  }
  0x60   :  { %935 = vmatpush1.bf16.msra.mxu0 %v1675_v35  ;;  %976 = vmatpush1.bf16.msra.mxu1 %v1678_v36  ;;  %p1907_p1 = pnand %p1906_p0, %p1900_p11 }
  0x61   :  { %936 = vmatprep.subr.bf16.mxu0 %v1683_v37  ;;  %977 = vmatprep.subr.bf16.mxu1 %v1686_v38 }
  0x64   :  { %937 = vmatpush1.bf16.msra.mxu0 %v1681_v39  ;;  %978 = vmatpush1.bf16.msra.mxu1 %v1684_v40 }
  0x65   :  { %938 = vmatprep.subr.bf16.mxu0 %v1689_v41  ;;  %979 = vmatprep.subr.bf16.mxu1 %v1692_v42 }
  0x68   :  { %939 = vmatpush1.bf16.msra.mxu0 %v1687_v43  ;;  %980 = vmatpush1.bf16.msra.mxu1 %v1690_v44 }
  0x69   :  { %940 = vmatprep.subr.bf16.mxu0 %v1695_v45  ;;  %981 = vmatprep.subr.bf16.mxu1 %v1698_v46  ;;  %v1743_v45 = vld [vmem:[#allocation8 + $0xb0] ss:$12 sps:$4 sm:$0xff]  }
  0x6a   :  { %v1744_v46 = vld [vmem:[#allocation8 + $0x230] ss:$12 sps:$4 sm:$0xff]  }
  0x6c   :  { %941 = vmatpush2.bf16.msra.mxu0 %v1693_v47  ;;  %982 = vmatpush2.bf16.msra.mxu1 %v1696_v48  ;;  %v1745_v48 = vld [vmem:[#allocation8 + $0x158] ss:$12 sps:$4 sm:$0xff]  }
  0x6d   :  { %942 = vmatprep.subr.bf16.mxu0 %v1701_v49  ;;  %983 = vmatprep.subr.bf16.mxu1 %v1704_v50  ;;  %v1746_v49 = vld [vmem:[#allocation8 + $0x2d8] ss:$12 sps:$4 sm:$0xff]  }
  0x6e   :  { %v1747_v50 = vld [vmem:[#allocation8 + $0x98] ss:$12 sps:$4 sm:$0xff]  }
  0x70   :  { %943 = vmatpush2.bf16.msra.mxu0 %v1699_v51  ;;  %984 = vmatpush2.bf16.msra.mxu1 %v1702_v52  ;;  %v1748_v51 = vld [vmem:[#allocation8 + $0x218] ss:$12 sps:$4 sm:$0xff]   ;;  %v1749_v52 = vld [vmem:[#allocation8 + $0x140] ss:$12 sps:$4 sm:$0xff]  }
  0x71   :  { %944 = vmatprep.subr.bf16.mxu0 %v1707_v53  ;;  %985 = vmatprep.subr.bf16.mxu1 %v1710_v54  ;;  %v1750_v53 = vld [vmem:[#allocation8 + $0x2c0] ss:$12 sps:$4 sm:$0xff]  }
  0x72   :  { %v1751_v54 = vld [vmem:[#allocation8 + $0x80] ss:$12 sps:$4 sm:$0xff]  }
  0x74   :  { %945 = vmatpush2.bf16.msra.mxu0 %v1705_v55  ;;  %986 = vmatpush2.bf16.msra.mxu1 %v1708_v56  ;;  %v1752_v55 = vld [vmem:[#allocation8 + $0x200] ss:$12 sps:$4 sm:$0xff]   ;;  %v1753_v56 = vld [vmem:[#allocation8 + $0x128] ss:$12 sps:$4 sm:$0xff]  }
  0x75   :  { %946 = vmatprep.subr.bf16.mxu0 %v1713_v57  ;;  %987 = vmatprep.subr.bf16.mxu1 %v1716_v58  ;;  %v1754_v57 = vld [vmem:[#allocation8 + $0x2a8] ss:$12 sps:$4 sm:$0xff]  }
  0x76   :  { %v1755_v58 = vld [vmem:[#allocation8 + $0x68] ss:$12 sps:$4 sm:$0xff]  }
  0x78   :  { %947 = vmatpush2.bf16.msra.mxu0 %v1711_v59  ;;  %988 = vmatpush2.bf16.msra.mxu1 %v1714_v60  ;;  %v1756_v59 = vld [vmem:[#allocation8 + $0x1e8] ss:$12 sps:$4 sm:$0xff]   ;;  %v1757_v60 = vld [vmem:[#allocation8 + $0x110] ss:$12 sps:$4 sm:$0xff]  }
  0x79   :  { %948 = vmatprep.subr.bf16.mxu0 %v1719_v61  ;;  %989 = vmatprep.subr.bf16.mxu1 %v1722_v62  ;;  %v1758_v61 = vld [vmem:[#allocation8 + $0x290] ss:$12 sps:$4 sm:$0xff]  }
  0x7a   :  { %v1759_v62 = vld [vmem:[#allocation8 + $0x50] ss:$12 sps:$4 sm:$0xff]  }
  0x7c   :  { %949 = vmatpush2.bf16.msra.mxu0 %v1717_v63  ;;  %990 = vmatpush2.bf16.msra.mxu1 %v1720_v0  ;;  %v1760_v63 = vld [vmem:[#allocation8 + $0x1d0] ss:$12 sps:$4 sm:$0xff]   ;;  %v1761_v0 = vld [vmem:[#allocation8 + $0xf8] ss:$12 sps:$4 sm:$0xff]  }
  0x7d   :  { %950 = vmatprep.subr.bf16.mxu0 %v1725_v1  ;;  %991 = vmatprep.subr.bf16.mxu1 %v1728_v2  ;;  %v1762_v1 = vld [vmem:[#allocation8 + $0x278] ss:$12 sps:$4 sm:$0xff]  }
  0x7e   :  { %v1763_v2 = vld [vmem:[#allocation8 + $0x38] ss:$12 sps:$4 sm:$0xff]  }
  0x80   :  { %951 = vmatpush2.bf16.msra.mxu0 %v1723_v3  ;;  %992 = vmatpush2.bf16.msra.mxu1 %v1726_v4  ;;  %v1764_v3 = vld [vmem:[#allocation8 + $0x1b8] ss:$12 sps:$4 sm:$0xff]   ;;  %v1765_v4 = vld [vmem:[#allocation8 + $0xe0] ss:$12 sps:$4 sm:$0xff]  }
  0x81   :  { %952 = vmatprep.subr.bf16.mxu0 %v1731_v5  ;;  %993 = vmatprep.subr.bf16.mxu1 %v1734_v6  ;;  %v1766_v5 = vld [vmem:[#allocation8 + $0x260] ss:$12 sps:$4 sm:$0xff]  }
  0x82   :  { %v1767_v6 = vld [vmem:[#allocation8 + $0x20] ss:$12 sps:$4 sm:$0xff]  }
  0x84   :  { %953 = vmatpush2.bf16.msra.mxu0 %v1729_v7  ;;  %994 = vmatpush2.bf16.msra.mxu1 %v1732_v8  ;;  %v1768_v7 = vld [vmem:[#allocation8 + $0x1a0] ss:$12 sps:$4 sm:$0xff]   ;;  %v1769_v8 = vld [vmem:[#allocation8 + $0xc8] ss:$12 sps:$4 sm:$0xff]  }
  0x85   :  { %954 = vmatprep.subr.bf16.mxu0 %v1737_v9  ;;  %995 = vmatprep.subr.bf16.mxu1 %v1740_v10  ;;  %v1770_v9 = vld [vmem:[#allocation8 + $0x248] ss:$12 sps:$4 sm:$0xff]  }
  0x86   :  { %v1771_v10 = vld [vmem:[#allocation8 + $0x8] ss:$12 sps:$4 sm:$0xff]  }
  0x88   :  { %955 = vmatpush2.bf16.msra.mxu0 %v1735_v11  ;;  %996 = vmatpush2.bf16.msra.mxu1 %v1738_v12  ;;  %v1772_v11 = vld [vmem:[#allocation8 + $0x188] ss:$12 sps:$4 sm:$0xff]   ;;  %v1773_v12 = vld [vmem:[#allocation10 + $0x78] sm:$0xff]  }
  0x89   :  { %1523 = vmatprep.subr.bf16.mxu0 %v1741_v13  ;;  %1545 = vmatprep.subr.bf16.mxu1 %v1742_v14  ;;  %v1774_v13 = vld [vmem:[#allocation10 + $0x38] sm:$0xff]   ;;  %v1775_v14 = vld [vmem:[#allocation10 + $0x70] sm:$0xff]  }
 0x10b   :  { %v211_v26 = vpop.f32.mrf.mxu0  ;;  %v252_v27 = vpop.f32.mrf.mxu1 }
 0x10c   :  { %v212_v28 = vadd.f32 %v211_v26, %v107_v22  ;;  %v253_v29 = vadd.f32 %v252_v27, %v115_v23  ;;  %v1779_v22 = vld [vmem:[#allocation10 + $0x60] sm:$0xff]   ;;  %v1783_v26 = vld [vmem:[#allocation10 + $0x50] sm:$0xff]  }
 0x10d   :  { %v213_v30 = vpop.f32.mrf.mxu0  ;;  %v254_v31 = vpop.f32.mrf.mxu1  ;;  %v1780_v23 = vld [vmem:[#allocation10 + $0x20] sm:$0xff]   ;;  %v1784_v27 = vld [vmem:[#allocation10 + $0x10] sm:$0xff]  }
 0x10e   :  { %v261_v32 = vmax.f32 %v253_v29, 0.0  ;;  %v214_v33 = vadd.f32 %v213_v30, %v111_v24  ;;  %v255_v34 = vadd.f32 %v254_v31, %v119_v25  ;;  %v259_v35 = vmax.f32 %v212_v28, 0.0  ;;  %v1781_v24 = vld [vmem:[#allocation10 + $0x58] sm:$0xff]   ;;  %v1785_v28 = vld [vmem:[#allocation10 + $0x48] sm:$0xff]   ;;  %v1787_v30 = vld [vmem:[#allocation10 + $0x40] sm:$0xff]  }
 0x10f   :  { %v215_v36 = vpop.f32.mrf.mxu0  ;;  %v256_v37 = vpop.f32.mrf.mxu1  ;;  %v1782_v25 = vld [vmem:[#allocation10 + $0x18] sm:$0xff]   ;;  %v1786_v29 = vld [vmem:[#allocation10 + $0x8] sm:$0xff]   ;;  %v1788_v31 = vld [vmem:[#allocation10] sm:$0xff]  }
 0x110   :  { %v260_v38 = vmax.f32 %v214_v33, 0.0  ;;  %v262_v39 = vmax.f32 %v255_v34, 0.0  ;;  %v2009_v40 = vpack.c.bf16 %v261_v32, %v261_v32  ;;  %v2011_v47 = vpack.c.bf16 %v259_v35, %v259_v35  ;;  %v1789_v32 = vld [vmem:[#allocation10 + $0xb8] sm:$0xff]   ;;  %v1790_v34 = vld [vmem:[#allocation10 + $0xb0] sm:$0xff]   ;;  %v1791_v35 = vld [vmem:[#allocation10 + $0xa8] sm:$0xff]  }
 0x111   :  { %v216_v41 = vpop.f32.mrf.mxu0  ;;  %v257_v42 = vpop.f32.mrf.mxu1  ;;  %v1939_v33 = vmov 0.0   ;;  %v1792_v36 = vld [vmem:[#allocation10 + $0xa0] sm:$0xff]   ;;  %v1793_v37 = vld [vmem:[#allocation10 + $0x98] sm:$0xff]  }
 0x112   :  { %v264_v43 = vpack.c.bf16 %v260_v38, %v260_v38  ;;  %v266_v44 = vpack.c.bf16 %v262_v39, %v262_v39  ;;  %v1794_v38 = vld [vmem:[#allocation10 + $0x90] sm:$0xff]   ;;  %v1795_v39 = vld [vmem:[#allocation10 + $0x88] sm:$0xff]  }
 0x113   :  { %v395_v41 = vld [vmem:[%s2036_s4] sm:$0x7] }
 0x114   :  { %956 = vmatprep.mubr.bf16.mxu0 %v264_v43  ;;  %997 = vmatprep.mubr.bf16.mxu1 %v266_v44  ;;  %v400_v42 = vrot.slane %v395_v41, %v106_v17 }
 0x115   :  { %957 = vmatmul.mubr.bf16.vlgmr.msra.gmra.mxu0 %v2011_v47  ;;  %998 = vmatmul.mubr.bf16.vlgmr.msra.gmra.mxu1 %v2009_v40 }
 0x116   :  { %1524 = vmatpush3.bf16.msra.mxu0 %v1743_v45  ;;  %1546 = vmatpush3.bf16.msra.mxu1 %v1744_v46 }
 0x117   :  { %1038 = vmatprep.mubr.bf16.mxu0 %v264_v43  ;;  %1078 = vmatprep.mubr.bf16.mxu1 %v266_v44  ;;  %v404_v43 = vrot.slane %v395_v41, %v110_v20 }
 0x118   :  { %1525 = vmatprep.subr.bf16.mxu0 %v1745_v48  ;;  %1547 = vmatprep.subr.bf16.mxu1 %v1746_v49 }
 0x11a   :  { %1526 = vmatpush3.bf16.msra.mxu0 %v1747_v50  ;;  %1548 = vmatpush3.bf16.msra.mxu1 %v1748_v51 }
 0x11b   :  { %1527 = vmatprep.subr.bf16.mxu0 %v1749_v52  ;;  %1549 = vmatprep.subr.bf16.mxu1 %v1750_v53 }
 0x11e   :  { %1528 = vmatpush3.bf16.msra.mxu0 %v1751_v54  ;;  %1550 = vmatpush3.bf16.msra.mxu1 %v1752_v55 }
 0x11f   :  { %1529 = vmatprep.subr.bf16.mxu0 %v1753_v56  ;;  %1551 = vmatprep.subr.bf16.mxu1 %v1754_v57 }
 0x122   :  { %1530 = vmatpush3.bf16.msra.mxu0 %v1755_v58  ;;  %1552 = vmatpush3.bf16.msra.mxu1 %v1756_v59 }
 0x123   :  { %1531 = vmatprep.subr.bf16.mxu0 %v1757_v60  ;;  %1553 = vmatprep.subr.bf16.mxu1 %v1758_v61  ;;  %v408_v60 = vrot.slane %v395_v41, %v114_v18 }
 0x126   :  { %1532 = vmatpush3.bf16.msra.mxu0 %v1759_v62  ;;  %1554 = vmatpush3.bf16.msra.mxu1 %v1760_v63 }
 0x127   :  { %1533 = vmatprep.subr.bf16.mxu0 %v1761_v0  ;;  %1555 = vmatprep.subr.bf16.mxu1 %v1762_v1 }
 0x12a   :  { %1534 = vmatpush3.bf16.msra.mxu0 %v1763_v2  ;;  %1556 = vmatpush3.bf16.msra.mxu1 %v1764_v3 }
 0x12b   :  { %1535 = vmatprep.subr.bf16.mxu0 %v1765_v4  ;;  %1557 = vmatprep.subr.bf16.mxu1 %v1766_v5 }
 0x12e   :  { %1536 = vmatpush3.bf16.msra.mxu0 %v1767_v6  ;;  %1558 = vmatpush3.bf16.msra.mxu1 %v1768_v7 }
 0x12f   :  { %1537 = vmatprep.subr.bf16.mxu0 %v1769_v8  ;;  %1559 = vmatprep.subr.bf16.mxu1 %v1770_v9 }
 0x132   :  { %1538 = vmatpush3.bf16.msra.mxu0 %v1771_v10  ;;  %1560 = vmatpush3.bf16.msra.mxu1 %v1772_v11 }
 0x133   :  { %1567 = vmatprep.subr.bf16.mxu0 %v1773_v12  ;;  %1598 = vmatprep.subr.bf16.mxu1 %v1939_v33 }
 0x135   :  { %1039 = vmatmul.mubr.bf16.vlgmr.msra.gmra.mxu0 %v2011_v47  ;;  %1079 = vmatmul.mubr.bf16.vlgmr.msra.gmra.mxu1 %v2009_v40  ;;  %v1796_v40 = vld [vmem:[#allocation10 + $0x80] sm:$0xff]  }
 0x136   :  { %1568 = vmatpush3.bf16.msra.mxu0 %v1774_v13  ;;  %1599 = vmatpush3.bf16.msra.mxu1 %v1789_v32 }
 0x137   :  { %1569 = vmatprep.subr.bf16.mxu0 %v1775_v14  ;;  %1600 = vmatprep.subr.bf16.mxu1 %v1939_v33 }
 0x138   :  { %1614 = vmatprep.mubr.msk.bf16.mxu1 %vm1940_vm2, %v1939_v33 }
 0x13a   :  { %1570 = vmatpush3.bf16.msra.mxu0 %v1776_v15  ;;  %1601 = vmatpush3.bf16.msra.mxu1 %v1790_v34 }
 0x13b   :  { %1571 = vmatprep.subr.bf16.mxu0 %v1777_v19  ;;  %1602 = vmatprep.subr.bf16.mxu1 %v1939_v33 }
 0x13e   :  { %1572 = vmatpush3.bf16.msra.mxu0 %v1778_v21  ;;  %1603 = vmatpush3.bf16.msra.mxu1 %v1791_v35 }
 0x13f   :  { %1573 = vmatprep.subr.bf16.mxu0 %v1779_v22  ;;  %1604 = vmatprep.subr.bf16.mxu1 %v1939_v33 }
 0x142   :  { %1574 = vmatpush3.bf16.msra.mxu0 %v1780_v23  ;;  %1605 = vmatpush3.bf16.msra.mxu1 %v1792_v36 }
 0x143   :  { %1575 = vmatprep.subr.bf16.mxu0 %v1781_v24  ;;  %1606 = vmatprep.subr.bf16.mxu1 %v1939_v33 }
 0x146   :  { %1576 = vmatpush3.bf16.msra.mxu0 %v1782_v25  ;;  %1607 = vmatpush3.bf16.msra.mxu1 %v1793_v37 }
 0x147   :  { %1577 = vmatprep.subr.bf16.mxu0 %v1783_v26  ;;  %1608 = vmatprep.subr.bf16.mxu1 %v1939_v33 }
 0x14a   :  { %1578 = vmatpush3.bf16.msra.mxu0 %v1784_v27  ;;  %1609 = vmatpush3.bf16.msra.mxu1 %v1794_v38 }
 0x14b   :  { %1579 = vmatprep.subr.bf16.mxu0 %v1785_v28  ;;  %1610 = vmatprep.subr.bf16.mxu1 %v1939_v33 }
 0x14e   :  { %1580 = vmatpush3.bf16.msra.mxu0 %v1786_v29  ;;  %1611 = vmatpush3.bf16.msra.mxu1 %v1795_v39 }
 0x14f   :  { %1581 = vmatprep.subr.bf16.mxu0 %v1787_v30  ;;  %1612 = vmatprep.subr.bf16.mxu1 %v1939_v33 }
 0x152   :  { %1582 = vmatpush3.bf16.msra.mxu0 %v1788_v31  ;;  %1613 = vmatpush3.bf16.msra.mxu1 %v1796_v40 }
 0x1d5   :  { %v958_v44 = vpop.f32.mrf.mxu0  ;;  %v999_v45 = vpop.f32.mrf.mxu1 }
 0x1d6   :  { %v959_v46 = vadd.f32 %v958_v44, %v400_v42 }
 0x1d7   :  { %v960_v47 = vpop.f32.mrf.mxu0  ;;  %v1001_v48 = vpop.f32.mrf.mxu1 }
 0x1d8   :  { %v1000_v49 = vadd.f32 %v999_v45, %v959_v46  ;;  %v961_v50 = vadd.f32 %v960_v47, %v404_v43 }
 0x1d9   :  { %v962_v51 = vpop.f32.mrf.mxu0  ;;  %v1003_v52 = vpop.f32.mrf.mxu1 }
 0x1da   :  { %v1002_v53 = vadd.f32 %v1001_v48, %v961_v50  ;;  %v1086_v54 = vmax.f32 %v1000_v49, 0.0 }
 0x1db   :  { %v963_v55 = vpop.f32.mrf.mxu0  ;;  %v1004_v56 = vpop.f32.mrf.mxu1 }
 0x1dc   :  { %v1087_v57 = vmax.f32 %v1002_v53, 0.0  ;;  %v1089_v59 = vpack.c.bf16 %v1086_v54, %v1086_v54 }
 0x1de   :  { %v1090_v58 = vpack.c.bf16 %v1087_v57, %v1087_v57 }
 0x1e0   :  { %1323 = vmatprep.mubr.bf16.mxu0 %v1090_v58 }
 0x1e1   :  { %1324 = vmatmul.mubr.bf16.vlgmr.msra.gmra.mxu0 %v1089_v59 }
 0x1f5   :  { %v1539_v17 = vpop.f32.mrf.mxu0  ;;  %v1561_v20 = vpop.f32.mrf.mxu1 }
 0x1f7   :  { %v1540_v61 = vpop.f32.mrf.mxu0  ;;  %v1562_v62 = vpop.f32.mrf.mxu1 }
 0x1f8   :  { %v1541_v63 = vadd.f32 %v1540_v61, %v1539_v17  ;;  %v1563_v3 = vadd.f32 %v1562_v62, %v1561_v20 }
 0x1f9   :  { %v1542_v0 = vpop.f32.mrf.mxu0  ;;  %v1564_v1 = vpop.f32.mrf.mxu1 }
 0x1fa   :  { %v1041_v2 = vadd.f32 %v1541_v63, %v408_v60 }
 0x1fb   :  { %v1543_v4 = vpop.f32.mrf.mxu0  ;;  %v1565_v5 = vpop.f32.mrf.mxu1 }
 0x1fc   :  { %v1081_v6 = vadd.f32 %v1563_v3, %v1041_v2 }
 0x1fe   :  { %v1088_v7 = vmax.f32 %v1081_v6, 0.0 }
 0x200   :  { %v1091_v8 = vpack.c.bf16 %v1088_v7, %v1088_v7 }
 0x202   :  { %1615 = vmatmul.mubr.bf16.vlgmr.msra.gmra.mxu1 %v1091_v8 }
 0x2a1   :  { %v1583_v9 = vpop.f32.mrf.mxu0 }
 0x2a3   :  { %v1584_v10 = vpop.f32.mrf.mxu0 }
 0x2a4   :  { %v1585_v13 = vadd.f32 %v1584_v10, %v1583_v9 }
 0x2a5   :  { %v1586_v11 = vpop.f32.mrf.mxu0 }
 0x2a6   :  { %v1326_v18 = vadd.f32 %v1585_v13, %v1498_v16 }
 0x2a7   :  { %v1587_v12 = vpop.f32.mrf.mxu0 }
 0x2c2   :  { %v1365_v14 = vpop.f32.mrf.mxu1 }
 0x2c3   :  { %v1366_v15 = vadd.f32 %v1365_v14, %v1326_v18 }
 0x2c4   :  { %v1616_v19 = vpop.f32.mrf.mxu1 }
 0x2c5   :  { %1797 = vtanh.f32 %v1366_v15 }
 0x2c6   :  { %v1368_v21 = vpop.f32.mrf.mxu1 }
 0x2c8   :  { %v1617_v22 = vpop.f32.mrf.mxu1 }
 0x2d2   :  { %v1798_v23 = vpop.eup %1797 }
 0x2d3   :  { %1372 = vst [vmem:[#allocation11] sm:$0xff] %v1798_v23 }
 0x2d4   :  { %1910 = shalt.err (!%p1907_p1)
}
 0x2d5   :  { %1382 = dma.vmem_to_hbm [thread:$0]  %s1380_s8, 128, %s2039_s7, [#allocation4]  }
 0x2d6   :  { %1925 = dma.done.wait [#allocation4], 128  }
 0x2d7   :  { %1926 = vsyncadd [#allocation4], 4294967168 }
 0x2d8   :  { %1386 = vsyncpa [#allocation3], 1 }
 0x2d9   :  { %1387 = vsyncpa [#allocation6], 1 }
 0x2da   :  { %1388 = vsyncpa [#allocation9], 1 }
 0x2db   :  { %1389 = vsyncpa [#allocation4], 1 }

</bundles_post_ra>
